<compile_context>
chip_gen: v5e
topology: v5e:2x2
jax: 0.10.0
libtpu: 0.0.40
codegen_flags: <defaults>
</compile_context>

<pallas_src>
import functools

import numpy as np
import jax
import jax.numpy as jnp
from jax import lax
from jax.experimental import pallas as pl
from jax.experimental.pallas import tpu as pltpu


def _pick_tile(length):
    """Largest MXU-friendly tile that evenly divides `length` (else use full length)."""
    for t in (512, 256, 128):
        if length % t == 0:
            return t
    return length


def _flash_attn_kernel(q_ref, k_ref, v_ref, mask_ref, *rest, d_k, train, drop_p):
    if train:
        keep_ref, o_ref, m_scr, l_scr, acc_scr = rest
    else:
        o_ref, m_scr, l_scr, acc_scr = rest

    ki = pl.program_id(2)

    # --- init accumulators at the first kv tile ---------------------------------
    @pl.when(ki == 0)
    def _():
        m_scr[...] = jnp.full(m_scr.shape, -jnp.inf, dtype=m_scr.dtype)
        l_scr[...] = jnp.zeros(l_scr.shape, dtype=l_scr.dtype)
        acc_scr[...] = jnp.zeros(acc_scr.shape, dtype=acc_scr.dtype)

    q = q_ref[0]        # (tq, Dk)
    k = k_ref[0]        # (tk, Dk)
    v = v_ref[0]        # (tk, Dv)
    mask = mask_ref[0]  # (tq, tk) int8, nonzero => masked

    # scores = Q @ K^T / sqrt(d_k); contract the d_k axes directly (no transpose),
    # accumulate in f32 on the MXU.
    s = lax.dot_general(
        q, k,
        dimension_numbers=(((1,), (1,)), ((), ())),
        preferred_element_type=jnp.float32,
    ) * jnp.float32(d_k ** -0.5)

    # masked_fill_(attn_mask, -10000.0)
    s = jnp.where(mask != 0, jnp.float32(-10000.0), s)

    # --- online softmax update (all in f32) --------------------------------------
    m_prev = m_scr[...]                                   # (tq, 1)
    m_new = jnp.maximum(m_prev, jnp.max(s, axis=-1, keepdims=True))
    alpha = jnp.exp(m_prev - m_new)                       # rescale factor for old stats
    p = jnp.exp(s - m_new)                                # (tq, tk) unnormalized probs

    l_scr[...] = alpha * l_scr[...] + jnp.sum(p, axis=-1, keepdims=True)
    m_scr[...] = m_new

    if train:
        # Dropout(p): applied to softmax(scores). Since the row-normalizer l is a per-row
        # scalar, applying the keep-mask to the unnormalized probs and dividing by l at the
        # end is exactly dropout-after-softmax.
        keep = keep_ref[0] != 0
        p_drop = jnp.where(keep, p * jnp.float32(1.0 / (1.0 - drop_p)), jnp.float32(0.0))
    else:
        p_drop = p

    # Second matmul: cast probs to V's dtype so bf16 inputs keep the MXU in bf16.
    acc_scr[...] = alpha * acc_scr[...] + jnp.dot(
        p_drop.astype(v.dtype), v, preferred_element_type=jnp.float32)

    # --- finalize at the last kv tile --------------------------------------------
    @pl.when(ki == pl.num_programs(2) - 1)
    def _():
        inv_l = pl.reciprocal(l_scr[...], approx=True)
        o_ref[0] = (acc_scr[...] * inv_l).astype(o_ref.dtype)


def scaled_dot_product_attention(Q, K, V, attn_mask, *, train=False, drop_p=0.1,
                                 rng_key=None):
    """Q:[B,H,Lq,Dk]  K:[B,H,Lk,Dk]  V:[B,H,Lk,Dv]  attn_mask:[B,H,Lq,Lk] (True => masked)."""
    B, H, Lq, Dk = Q.shape
    Lk = K.shape[2]
    Dv = V.shape[3]
    BH = B * H

    q = Q.reshape(BH, Lq, Dk)
    k = K.reshape(BH, Lk, Dk)
    v = V.reshape(BH, Lk, Dv)
    m = attn_mask.reshape(BH, Lq, Lk).astype(jnp.int8)   # 1 byte/elem HBM stream

    tq = _pick_tile(Lq)
    tk = _pick_tile(Lk)
    n_q = Lq // tq
    n_k = Lk // tk

    use_dropout = bool(train) and 0.0 < drop_p < 1.0

    in_specs = [
        pl.BlockSpec((1, tq, Dk), lambda bh, qi, ki: (bh, qi, 0)),
        pl.BlockSpec((1, tk, Dk), lambda bh, qi, ki: (bh, ki, 0)),
        pl.BlockSpec((1, tk, Dv), lambda bh, qi, ki: (bh, ki, 0)),
        pl.BlockSpec((1, tq, tk), lambda bh, qi, ki: (bh, qi, ki)),
    ]
    inputs = [q, k, v, m]

    if use_dropout:
        if rng_key is None:
            rng_key = jax.random.PRNGKey(0)
        keep = jax.random.bernoulli(rng_key, 1.0 - drop_p, (BH, Lq, Lk)).astype(jnp.int8)
        in_specs.append(pl.BlockSpec((1, tq, tk), lambda bh, qi, ki: (bh, qi, ki)))
        inputs.append(keep)

    kernel = functools.partial(_flash_attn_kernel, d_k=Dk, train=use_dropout,
                               drop_p=drop_p)

    out = pl.pallas_call(
        kernel,
        out_shape=jax.ShapeDtypeStruct((BH, Lq, Dv), Q.dtype),
        grid_spec=pltpu.PrefetchScalarGridSpec(
            num_scalar_prefetch=0,
            grid=(BH, n_q, n_k),
            in_specs=in_specs,
            out_specs=pl.BlockSpec((1, tq, Dv), lambda bh, qi, ki: (bh, qi, 0)),
            scratch_shapes=[
                pltpu.VMEM((tq, 1), jnp.float32),    # running max  m
                pltpu.VMEM((tq, 1), jnp.float32),    # running sum  l
                pltpu.VMEM((tq, Dv), jnp.float32),   # output accumulator
            ],
        ),
        compiler_params=pltpu.CompilerParams(
            dimension_semantics=("parallel", "parallel", "arbitrary"),
            vmem_limit_bytes=32 * 1024 * 1024,
        ),
    )(*inputs)

    return out.reshape(B, H, Lq, Dv)


def _reference_eval(Q, K, V, attn_mask, d_k):
    # Pure-JAX reference (dropout in eval mode == identity).
    scores = jnp.einsum('bhqd,bhkd->bhqk', Q, K) / np.sqrt(d_k)
    scores = jnp.where(attn_mask, -10000.0, scores)
    attn = jax.nn.softmax(scores, axis=-1)
    return jnp.einsum('bhqk,bhkd->bhqd', attn, V)


if __name__ == "__main__":
    # Small shapes consistent with the module's forward signature.
    B, H, L, Dk, Dv = 2, 2, 8, 32, 32

    key = jax.random.PRNGKey(0)
    kq, kk, kv, kd = jax.random.split(key, 4)
    Q = jax.random.normal(kq, (B, H, L, Dk), dtype=jnp.float32)
    K = jax.random.normal(kk, (B, H, L, Dk), dtype=jnp.float32)
    V = jax.random.normal(kv, (B, H, L, Dv), dtype=jnp.float32)
    # Causal mask: True => position is masked (filled with -10000).
    causal = jnp.triu(jnp.ones((L, L), dtype=bool), k=1)
    attn_mask = jnp.broadcast_to(causal, (B, H, L, L))

    # Eval mode (dropout identity) for a deterministic correctness check.
    out = scaled_dot_product_attention(Q, K, V, attn_mask, train=False)
    out = jax.block_until_ready(out)

    ref = _reference_eval(Q, K, V, attn_mask, Dk)
    # Tolerance covers the EUP approximate reciprocal in the softmax finalize.
    np.testing.assert_allclose(np.asarray(out), np.asarray(ref),
                               rtol=5e-3, atol=5e-3)

    # Also exercise the dropout (training) path once to make sure it lowers/runs.
    out_train = scaled_dot_product_attention(Q, K, V, attn_mask,
                                             train=True, drop_p=0.1, rng_key=kd)
    jax.block_until_ready(out_train)

    print("KERNEL_OK")
</pallas_src>

<mosaic_0001>
module attributes {stable_mosaic.version = 11 : i64} {
  func.func @_flash_attn_kernel(%arg0: i32, %arg1: i32, %arg2: i32, %arg3: memref<1x8x32xf32, #tpu.memory_space<vmem>>, %arg4: memref<1x8x32xf32, #tpu.memory_space<vmem>>, %arg5: memref<1x8x32xf32, #tpu.memory_space<vmem>>, %arg6: memref<1x8x8xi8, #tpu.memory_space<vmem>>, %arg7: memref<1x8x32xf32, #tpu.memory_space<vmem>>, %arg8: memref<8x1xf32, #tpu.memory_space<vmem>>, %arg9: memref<8x1xf32, #tpu.memory_space<vmem>>, %arg10: memref<8x32xf32, #tpu.memory_space<vmem>>) attributes {dimension_semantics = [#tpu.dimension_semantics<parallel>, #tpu.dimension_semantics<parallel>, #tpu.dimension_semantics<arbitrary>], iteration_bounds = array<i64: 4, 1, 1>, scalar_prefetch = 0 : i64, scratch_operands = 3 : i64, tpu.core_type = #tpu.core_type<tc>, window_params = [{transform_indices = @transform_0, window_bounds = array<i64: 1, 8, 32>}, {transform_indices = @transform_1, window_bounds = array<i64: 1, 8, 32>}, {transform_indices = @transform_2, window_bounds = array<i64: 1, 8, 32>}, {transform_indices = @transform_3, window_bounds = array<i64: 1, 8, 8>}, {transform_indices = @transform_4, window_bounds = array<i64: 1, 8, 32>}]} {
    %c0_i32 = arith.constant 0 : i32
    %0 = arith.cmpi eq, %arg2, %c0_i32 : i32
    %1 = arith.extui %0 : i1 to i32
    %c0_i32_0 = arith.constant 0 : i32
    %2 = arith.cmpi ne, %1, %c0_i32_0 : i32
    scf.if %2 {
      %cst_31 = arith.constant 0xFF800000 : f32
      %43 = vector.broadcast %cst_31 : f32 to vector<8x1xf32>
      %c0_32 = arith.constant 0 : index
      %c0_33 = arith.constant 0 : index
      %44 = vector.load %arg8[%c0_32, %c0_33] : memref<8x1xf32, #tpu.memory_space<vmem>>, vector<8x1xf32>
      tpu.vector_store %arg8[%c0_32, %c0_33], %43 {strides = array<i32>} : memref<8x1xf32, #tpu.memory_space<vmem>>, vector<8x1xf32>,
      %cst_34 = arith.constant 0.000000e+00 : f32
      %45 = vector.broadcast %cst_34 : f32 to vector<8x1xf32>
      %c0_35 = arith.constant 0 : index
      %c0_36 = arith.constant 0 : index
      %46 = vector.load %arg9[%c0_35, %c0_36] : memref<8x1xf32, #tpu.memory_space<vmem>>, vector<8x1xf32>
      tpu.vector_store %arg9[%c0_35, %c0_36], %45 {strides = array<i32>} : memref<8x1xf32, #tpu.memory_space<vmem>>, vector<8x1xf32>,
      %cst_37 = arith.constant 0.000000e+00 : f32
      %47 = vector.broadcast %cst_37 : f32 to vector<8x32xf32>
      %c0_38 = arith.constant 0 : index
      %c0_39 = arith.constant 0 : index
      %48 = vector.load %arg10[%c0_38, %c0_39] : memref<8x32xf32, #tpu.memory_space<vmem>>, vector<8x32xf32>
      tpu.vector_store %arg10[%c0_38, %c0_39], %47 {strides = array<i32>} : memref<8x32xf32, #tpu.memory_space<vmem>>, vector<8x32xf32>,
    } else {
    }
    %c0 = arith.constant 0 : index
    %c0_1 = arith.constant 0 : index
    %c0_2 = arith.constant 0 : index
    %3 = vector.load %arg3[%c0, %c0_1, %c0_2] : memref<1x8x32xf32, #tpu.memory_space<vmem>>, vector<1x8x32xf32>
    %4 = vector.shape_cast %3 : vector<1x8x32xf32> to vector<8x32xf32>
    %c0_3 = arith.constant 0 : index
    %c0_4 = arith.constant 0 : index
    %c0_5 = arith.constant 0 : index
    %5 = vector.load %arg4[%c0_3, %c0_4, %c0_5] : memref<1x8x32xf32, #tpu.memory_space<vmem>>, vector<1x8x32xf32>
    %6 = vector.shape_cast %5 : vector<1x8x32xf32> to vector<8x32xf32>
    %c0_6 = arith.constant 0 : index
    %c0_7 = arith.constant 0 : index
    %c0_8 = arith.constant 0 : index
    %7 = vector.load %arg5[%c0_6, %c0_7, %c0_8] : memref<1x8x32xf32, #tpu.memory_space<vmem>>, vector<1x8x32xf32>
    %8 = vector.shape_cast %7 : vector<1x8x32xf32> to vector<8x32xf32>
    %c0_9 = arith.constant 0 : index
    %c0_10 = arith.constant 0 : index
    %c0_11 = arith.constant 0 : index
    %9 = vector.load %arg6[%c0_9, %c0_10, %c0_11] : memref<1x8x8xi8, #tpu.memory_space<vmem>>, vector<1x8x8xi8>
    %10 = vector.shape_cast %9 : vector<1x8x8xi8> to vector<8x8xi8>
    %cst = arith.constant dense<0.000000e+00> : vector<8x8xf32>
    %11 = tpu.matmul %4, %6, %cst {dimension_numbers = #tpu.dot_dimension_numbers<[1], [1], [0], [0], [0, 0, 1, 0], [], []>} : vector<8x32xf32>, vector<8x32xf32>, vector<8x8xf32> -> vector<8x8xf32>
    %cst_12 = arith.constant 0.176776692 : f32
    %12 = vector.broadcast %cst_12 : f32 to vector<8x8xf32>
    %13 = arith.mulf %11, %12 : vector<8x8xf32>
    %c0_i8 = arith.constant 0 : i8
    %14 = vector.broadcast %c0_i8 : i8 to vector<8x8xi8>
    %15 = arith.cmpi ne, %10, %14 : vector<8x8xi8>
    %cst_13 = arith.constant -1.000000e+04 : f32
    %16 = vector.broadcast %cst_13 : f32 to vector<8x8xf32>
    %17 = arith.select %15, %16, %13 : vector<8x8xi1>, vector<8x8xf32>
    %c0_14 = arith.constant 0 : index
    %c0_15 = arith.constant 0 : index
    %18 = vector.load %arg8[%c0_14, %c0_15] : memref<8x1xf32, #tpu.memory_space<vmem>>, vector<8x1xf32>
    %cst_16 = arith.constant dense<0xFF800000> : vector<8xf32>
    %19 = vector.multi_reduction <maximumf>, %17, %cst_16 [1] : vector<8x8xf32> to vector<8xf32>
    %20 = vector.shape_cast %19 : vector<8xf32> to vector<8x1xf32>
    %21 = arith.maximumf %18, %20 : vector<8x1xf32>
    %22 = arith.subf %18, %21 : vector<8x1xf32>
    %23 = math.exp %22 : vector<8x1xf32>
    %24 = vector.broadcast %21 : vector<8x1xf32> to vector<8x8xf32>
    %25 = arith.subf %17, %24 : vector<8x8xf32>
    %26 = math.exp %25 : vector<8x8xf32>
    %c0_17 = arith.constant 0 : index
    %c0_18 = arith.constant 0 : index
    %27 = vector.load %arg9[%c0_17, %c0_18] : memref<8x1xf32, #tpu.memory_space<vmem>>, vector<8x1xf32>
    %28 = arith.mulf %23, %27 : vector<8x1xf32>
    %cst_19 = arith.constant dense<0.000000e+00> : vector<8xf32>
    %29 = vector.multi_reduction <add>, %26, %cst_19 [1] : vector<8x8xf32> to vector<8xf32>
    %30 = vector.shape_cast %29 : vector<8xf32> to vector<8x1xf32>
    %31 = arith.addf %28, %30 : vector<8x1xf32>
    %c0_20 = arith.constant 0 : index
    %c0_21 = arith.constant 0 : index
    %32 = vector.load %arg9[%c0_20, %c0_21] : memref<8x1xf32, #tpu.memory_space<vmem>>, vector<8x1xf32>
    tpu.vector_store %arg9[%c0_20, %c0_21], %31 {strides = array<i32>} : memref<8x1xf32, #tpu.memory_space<vmem>>, vector<8x1xf32>,
    %c0_22 = arith.constant 0 : index
    %c0_23 = arith.constant 0 : index
    %33 = vector.load %arg8[%c0_22, %c0_23] : memref<8x1xf32, #tpu.memory_space<vmem>>, vector<8x1xf32>
    tpu.vector_store %arg8[%c0_22, %c0_23], %21 {strides = array<i32>} : memref<8x1xf32, #tpu.memory_space<vmem>>, vector<8x1xf32>,
    %c0_24 = arith.constant 0 : index
    %c0_25 = arith.constant 0 : index
    %34 = vector.load %arg10[%c0_24, %c0_25] : memref<8x32xf32, #tpu.memory_space<vmem>>, vector<8x32xf32>
    %35 = vector.broadcast %23 : vector<8x1xf32> to vector<8x32xf32>
    %36 = arith.mulf %35, %34 : vector<8x32xf32>
    %cst_26 = arith.constant dense<0.000000e+00> : vector<8x32xf32>
    %37 = tpu.matmul %26, %8, %cst_26 {dimension_numbers = #tpu.dot_dimension_numbers<[1], [0], [0], [1], [0, 0, 1, 1], [], []>} : vector<8x8xf32>, vector<8x32xf32>, vector<8x32xf32> -> vector<8x32xf32>
    %38 = arith.addf %36, %37 : vector<8x32xf32>
    %c0_27 = arith.constant 0 : index
    %c0_28 = arith.constant 0 : index
    %39 = vector.load %arg10[%c0_27, %c0_28] : memref<8x32xf32, #tpu.memory_space<vmem>>, vector<8x32xf32>
    tpu.vector_store %arg10[%c0_27, %c0_28], %38 {strides = array<i32>} : memref<8x32xf32, #tpu.memory_space<vmem>>, vector<8x32xf32>,
    %c0_i32_29 = arith.constant 0 : i32
    %40 = arith.cmpi eq, %arg2, %c0_i32_29 : i32
    %41 = arith.extui %40 : i1 to i32
    %c0_i32_30 = arith.constant 0 : i32
    %42 = arith.cmpi ne, %41, %c0_i32_30 : i32
    scf.if %42 {
      %c0_31 = arith.constant 0 : index
      %c0_32 = arith.constant 0 : index
      %43 = vector.load %arg9[%c0_31, %c0_32] : memref<8x1xf32, #tpu.memory_space<vmem>>, vector<8x1xf32>
      %44 = tpu.reciprocal %43 {approx = true} : vector<8x1xf32> -> vector<8x1xf32>
      %c0_33 = arith.constant 0 : index
      %c0_34 = arith.constant 0 : index
      %45 = vector.load %arg10[%c0_33, %c0_34] : memref<8x32xf32, #tpu.memory_space<vmem>>, vector<8x32xf32>
      %46 = vector.broadcast %44 : vector<8x1xf32> to vector<8x32xf32>
      %47 = arith.mulf %45, %46 : vector<8x32xf32>
      %c0_35 = arith.constant 0 : index
      %c0_36 = arith.constant 0 : index
      %c0_37 = arith.constant 0 : index
      %48 = vector.load %arg7[%c0_35, %c0_36, %c0_37] : memref<1x8x32xf32, #tpu.memory_space<vmem>>, vector<1x8x32xf32>
      %49 = vector.shape_cast %48 : vector<1x8x32xf32> to vector<8x32xf32>
      %50 = vector.shape_cast %47 : vector<8x32xf32> to vector<1x8x32xf32>
      tpu.vector_store %arg7[%c0_35, %c0_36, %c0_37], %50 {strides = array<i32>} : memref<1x8x32xf32, #tpu.memory_space<vmem>>, vector<1x8x32xf32>,
    } else {
    }
    return
  }
  func.func @transform_0(%arg0: i32, %arg1: i32, %arg2: i32) -> (i32, i32, i32) {
    %c0_i32 = arith.constant 0 : i32
    %c0_i32_0 = arith.constant 0 : i32
    return %arg0, %arg1, %c0_i32 : i32, i32, i32
  }
  func.func @transform_1(%arg0: i32, %arg1: i32, %arg2: i32) -> (i32, i32, i32) {
    %c0_i32 = arith.constant 0 : i32
    %c0_i32_0 = arith.constant 0 : i32
    return %arg0, %arg2, %c0_i32 : i32, i32, i32
  }
  func.func @transform_2(%arg0: i32, %arg1: i32, %arg2: i32) -> (i32, i32, i32) {
    %c0_i32 = arith.constant 0 : i32
    %c0_i32_0 = arith.constant 0 : i32
    return %arg0, %arg2, %c0_i32 : i32, i32, i32
  }
  func.func @transform_3(%arg0: i32, %arg1: i32, %arg2: i32) -> (i32, i32, i32) {
    %c0_i32 = arith.constant 0 : i32
    return %arg0, %arg1, %arg2 : i32, i32, i32
  }
  func.func @transform_4(%arg0: i32, %arg1: i32, %arg2: i32) -> (i32, i32, i32) {
    %c0_i32 = arith.constant 0 : i32
    %c0_i32_0 = arith.constant 0 : i32
    return %arg0, %arg1, %c0_i32 : i32, i32, i32
  }
}

</mosaic_0001>

<bundles_post_ra>
// kernel: tpu_custom_call.1
= control target key start
LH: loop header
LB: loop body
LE: loop exit
PB: predicated region body
PF: predicated region fallthrough
CT: control target
= control target key end

     0   :  { %s1196_s0 = inlined_call_operand.hbm [shape: f32[4,8,32], index: 0, kind: input, shape index: {}]   ;;  %s1197_s1 = inlined_call_operand.hbm [shape: f32[4,8,32], index: 1, kind: input, shape index: {}]   ;;  %s1198_s2 = inlined_call_operand.hbm [shape: f32[4,8,32], index: 2, kind: input, shape index: {}]   ;;  %s1199_s3 = inlined_call_operand.hbm [shape: s8[4,8,8], index: 3, kind: input, shape index: {}]   ;;  %s1200_s4 = inlined_call_operand.hbm [shape: f32[4,8,32], index: 4, kind: output, shape index: {}]  }
   0x1   :  { %1204 = sst [smem:[#allocation22_spill]] %s1196_s0 }
   0x2   :  { %1205 = sst [smem:[#allocation23_spill]] %s1197_s1 }
   0x3   :  { %9 = vsyncpa [#allocation6], 0 }
   0x4   :  { %11 = vsyncpa [#allocation6 + $0x1], 0 }
   0x5   :  { %12 = vsyncpa [#allocation9], 0 }
   0x6   :  { %14 = vsyncpa [#allocation9 + $0x1], 0 }
   0x7   :  { %15 = vsyncpa [#allocation12], 0 }
   0x8   :  { %17 = vsyncpa [#allocation12 + $0x1], 0 }
   0x9   :  { %18 = vsyncpa [#allocation7], 0 }
   0xa   :  { %20 = vsyncpa [#allocation7 + $0x1], 0  ;;  %s1008_s15 = smov 0   ;;  %s1010_s16 = smov 0  }
   0xb   :  { %s1012_s17 = smov 0   ;;  %s1014_s18 = smov 0  }
   0xc   :  { %s1016_s19 = smov 0   ;;  %s1018_s20 = smov 0  }
   0xd LB: > { %1206 = sst [smem:[#allocation18_spill]] %s966_s17  ;;  %s1039_s21 = sadd.s32 4294967295, %s978_s20   ;;  %s978_s20 = sphi %s1018_s20, %s26_s20   ;;  %s974_s19 = sphi %s1016_s19, %s1225_s19   ;;  %s970_s18 = sphi %s1014_s18, %s1224_s18   ;;  %s966_s17 = sphi %s1012_s17, %s1220_s17   ;;  %s962_s16 = sphi %s1010_s16, %s1223_s16   ;;  %s958_s15 = sphi %s1008_s15, %s1222_s15  }
   0xe   : > { %s655_s22 = sadd.s32 4294967294, %s978_s20   ;;  %s45_s23 = sadd.s32 1, %s974_s19 }
   0xf   : > { %s54_s24 = sadd.s32 1, %s966_s17  ;;  %p47_p0 = scmp.ge.s32.totalorder %s45_s23, 4 }
  0x10   : > { %p61_p1 = scmp.ne.s32.totalorder %s966_s17, %s962_s16  ;;  %p62_p2 = scmp.eq.s32.totalorder %s978_s20, 0 }
  0x11   : > { %p67_p3 = scmp.ne.s32.totalorder %s962_s16, %s958_s15  ;;  %s1227_s23 = smov (%p47_p0, %s45_s23), 0 }
  0x12   : > { %1207 = sst [smem:[#allocation19_spill]] %s1227_s23  ;;  %p1051_p4 = por %p62_p2, %p61_p1 }
  0x13   : > { %p68_p5 = scmp.eq.s32.totalorder %s1039_s21, 0  ;;  %s49_s26 = ssub.s32 %s974_s19, %s1227_s23 }
  0x14   : > { %p179_p6 = scmp.eq.s32.totalorder %s1039_s21, 3  ;;  %p52_p7 = scmp.eq.s32.totalorder %s49_s26, 0 }
  0x15   : > { %p1059_p8 = por %p68_p5, %p67_p3  ;;  %p185_p10 = scmp.eq.s32.totalorder %s655_s22, 3 }
  0x16   : > { %p1063_p9 = por %p179_p6, %p61_p1  ;;  %p706_p12 = scmp.lt.s32.totalorder %s978_s20, 4 }
  0x17   : > { %s1068_s29 = scalar_select %p52_p7, %s966_s17, %s54_s24  }
  0x18   : > { %p1070_p11 = por %p185_p10, %p67_p3  ;;  %s1076_s5 = sand.u32 1, %s966_s17  }
  0x19   : > { %1211 = sst [smem:[#allocation20_spill]] %s1068_s29  ;;  %s658_s6 = sshll.u32 %s1076_s5, 3 }
  0x1a   : > { %s1212_s30 = scalar_select %p1070_p11, 1, 0 }
  0x1b   : > { %s659_s7 = sshll.u32 %s974_s19, 3  ;;  %p1082_p13 = pnand %p706_p12, %p1051_p4 }
  0x1c   : > { %1213 = sst [smem:[#allocation21_spill]] %s1212_s30  ;;  %s225_s9 = sand.u32 1, %s978_s20  }
  0x1d   : > { %s1215_s1 = sld [smem:[#allocation23_spill]]  ;;  %s229_s14 = scalar_lea.vmem [#allocation8], %s658_s6 }
  0x1e   : > { %s238_s22 = sshll.u32 %s229_s14, 4  ;;  %s226_s24 = scalar_lea.sflag [#allocation9], %s225_s9  ;;  %s239_s22 = int_to_ptr.vmem [resolvable:$true] %s238_s22 }
  0x1f   : > { %p666_p0 = scmp.ge.s32.totalorder %s978_s20, 1  ;;  %p284_p1 = scmp.lt.s32.totalorder %s978_s20, 5 }
  0x20   : > { %s1217_s0 = sld [smem:[#allocation22_spill]]  ;;  %s209_s14 = scalar_lea.vmem [#allocation5], %s658_s6 }
  0x21   : > { %p1094_p2 = pnand %p666_p0, %p284_p1  ;;  %s206_s9 = scalar_lea.sflag [#allocation6], %s1076_s5 }
  0x22   : > { %s254_s23 = scalar_lea.hbm %s1198_s2, %s659_s7  ;;  %s249_s17 = scalar_lea.vmem [#allocation10], %s658_s6 }
  0x23   : > { %s234_s12 = scalar_lea.hbm %s1215_s1, %s659_s7  ;;  %s218_s1 = sshll.u32 %s209_s14, 4  ;;  %s219_s1 = int_to_ptr.vmem [resolvable:$true] %s218_s1 }
  0x24   : > { %s236_s13 = sshll.u32 %s234_s12, 4  ;;  %s256_s29 = sshll.u32 %s254_s23, 4  ;;  %s237_s13 = int_to_ptr.hbm [resolvable:$true] %s236_s13  ;;  %s257_s29 = int_to_ptr.hbm [resolvable:$true] %s256_s29 }
  0x25   : > { %695 = dma.hbm_to_vmem [thread:$0]  (!%p1082_p13), %s237_s13, 128, %s239_s22, %s226_s24  }
  0x26   : > { %s214_s11 = scalar_lea.hbm %s1217_s0, %s659_s7  ;;  %s258_s26 = sshll.u32 %s249_s17, 4  ;;  %s259_s26 = int_to_ptr.vmem [resolvable:$true] %s258_s26 }
  0x27   : > { %s216_s12 = sshll.u32 %s214_s11, 4  ;;  %s664_s10 = sshll.u32 %s1076_s5, 1  ;;  %s217_s12 = int_to_ptr.hbm [resolvable:$true] %s216_s12 }
  0x28   : > { %692 = dma.hbm_to_vmem [thread:$0]  (!%p1082_p13), %s217_s12, 128, %s219_s1, %s206_s9  }
  0x29   : > { %698 = dma.hbm_to_vmem [thread:$0]  (!%p1082_p13), %s257_s29, 128, %s259_s26, %s226_s24  }
  0x2a   : > { %s665_s11 = sshll.u32 %s974_s19, 1  ;;  %s269_s1 = scalar_lea.vmem [#allocation11], %s664_s10 }
  0x2b   : > { %s275_s30 = scalar_lea.hbm %s1199_s3, %s665_s11  ;;  %s279_s12 = sshll.u32 %s269_s1, 4  ;;  %s280_s12 = int_to_ptr.vmem [resolvable:$true] %s279_s12 }
  0x2c   : > { %s277_s9 = sshll.u32 %s275_s30, 4  ;;  %s266_s7 = scalar_lea.sflag [#allocation12], %s1076_s5  ;;  %s278_s9 = int_to_ptr.hbm [resolvable:$true] %s277_s9 }
  0x2d   : > { %701 = dma.hbm_to_vmem [thread:$0]  (!%p1082_p13), %s278_s9, 32, %s280_s12, %s266_s7  }
  0x2e   : > { %288 = sbr.rel (%p1094_p2) target bundleno = 666 (0x29a), region = 36  ;;  %s1120_s17 = sand.u32 (!%p1094_p2), 1, %s962_s16  }
  0x2f   : > { %s1123_s23 = sshll.u32 (!%p1094_p2), %s1120_s17, 3  ;;  %s291_s0 = scalar_lea.sflag (!%p1094_p2), [#allocation6], %s1120_s17 }
  0x30   : > { %s294_s29 = scalar_lea.vmem (!%p1094_p2), [#allocation5], %s1123_s23 }
  0x33   : > { %941 = dma.done.wait (%p1059_p8), %s291_s0, 128  }
  0x34   : > { %943 = vsyncadd (%p1059_p8), %s291_s0, 4294967168  ;;  %s300_s30 = sand.u32 1, %s1039_s21   ;;  %s304_s6 = scalar_lea.vmem [#allocation8], %s1123_s23 }
  0x35   : > { %s301_s5 = scalar_lea.sflag [#allocation9], %s300_s30 }
  0x36   : > { %945 = dma.done.wait (%p1059_p8), %s301_s5, 256  }
  0x37   : > { %947 = vsyncadd (%p1059_p8), %s301_s5, 4294967040  ;;  %s670_s8 = sshll.u32 %s1120_s17, 1  ;;  %s314_s24 = scalar_lea.vmem [#allocation10], %s1123_s23 }
  0x38   : > { %s321_s25 = scalar_lea.sflag [#allocation12], %s1120_s17  ;;  %s324_s13 = scalar_lea.vmem [#allocation11], %s670_s8 }
  0x39   : > { %949 = dma.done.wait (%p1059_p8), %s321_s25, 32  }
  0x3a   : > { %951 = vsyncadd (%p1059_p8), %s321_s25, 4294967264  ;;  %vm374_vm0 = vcmask 261120   ;;  %v980_v0 = vmov 0.0   ;;  %v377_v1 = vld [vmem:[%s304_s6] sm:$0xff]  ;;  %v376_v2 = vld [vmem:[%s294_s29] sm:$0xff]  ;;  %v981_v3 = vmov 0  }
  0x3b   : > { %375 = vst.msk [vmem:[#allocation4] sm:$0xff] %vm374_vm0, %v980_v0  ;;  %672 = vmatpush.xpose.msk.msra.mxu0 %vm374_vm0, %v377_v1  ;;  %759 = vset.pattern.permute.xlu0 %v981_v3  ;;  %vm371_vm1 = vcmask 7168   ;;  %v982_v4 = vmov -inf   ;;  %v379_v5 = vld [vmem:[%s324_s13] sm:$0x3]  ;;  %vm414_vm4 = vcmask 64512  }
  0x3c   : > { %760 = vset.pattern.permute.xlu1 %v981_v3  ;;  %761 = vset.pattern.permute.xlu2 %v981_v3  ;;  %372 = vst.msk [vmem:[#allocation2] sm:$0xff] %vm371_vm1, %v982_v4  ;;  %vm408_vm2 = vnez %v379_v5  ;;  %v378_v16 = vld [vmem:[%s314_s24] sm:$0xff]  ;;  %s676_s21 = sshll.u32 %s970_s18, 3  ;;  %s364_s10 = scalar_lea.vmem [#allocation13], %s1123_s23 }
  0x3d   : > { %373 = vst.msk [vmem:[#allocation3] sm:$0xff] %vm371_vm1, %v980_v0  ;;  %v409_v6 = vsel %vm408_vm2, 16843009, %v981_v3  ;;  %464 = vmatpush.msra.mxu1 %v378_v16  ;;  %s496_s26 = scalar_lea.hbm %s1200_s4, %s676_s21  ;;  %s498_s11 = sshll.u32 %s364_s10, 4  ;;  %s499_s11 = int_to_ptr.vmem [resolvable:$true] %s498_s11 }
  0x3e   : > { %673 = vmatmul.msk.f32.vlgmr.msra.gmra.mxu0 %vm374_vm0, %v376_v2  ;;  %v410_v7 = vunpack.c.0.s8 %v409_v6  ;;  %s500_s14 = sshll.u32 %s496_s26, 4  ;;  %s485_s1 = scalar_lea.sflag [#allocation7], %s1120_s17  ;;  %s501_s14 = int_to_ptr.hbm [resolvable:$true] %s500_s14 }
  0x3f   : > { %s902_s12 = sshra.s32 %s501_s14, 4  ;;  %s908_s23 = scalar_lea.hbm %s1200_s4, 32  ;;  %s903_s12 = int_to_ptr.hbm [resolvable:$true] %s902_s12 }
  0x40   : > { %vm411_vm3 = vcmp.ne.s32.totalorder %v410_v7, 0  ;;  %s904_s9 = scalar_lea.hbm %s903_s12, 8  ;;  %p909_p6 = scmp.lt.s32.totalorder %s903_s12, %s1200_s4 }
  0x41   : > { %p905_p3 = scmp.ne.s32.totalorder %s903_s12, %s904_s9  ;;  %p910_p7 = scmp.lt.s32.totalorder %s908_s23, %s904_s9 }
  0x42   : > { %v439_v30 = vld [vmem:[#allocation4] sm:$0xff] }
  0x43   : > { %v413_v12 = vld [vmem:[#allocation2] sm:$0xff]  ;;  %p906_p4 = pnand %p905_p3, %p1063_p9  ;;  %p911_p8 = por %p910_p7, %p909_p6 }
  0x44   : > { %v430_v24 = vld [vmem:[#allocation3] sm:$0xff] }
  0x45   : > { %p907_p5 = pneg %p906_p4 }
  0x47   : > { %p912_p10 = pnand %p911_p8, %p907_p5 }
  0xbb   : > { %v404_v8 = vpop.f32.mrf.mxu0 }
  0xbc   : > { %v407_v9 = vmul.f32 0.17677669, %v404_v8 }
  0xbe   : > { %v412_v10 = vsel %vm411_vm3, -10000.0, %v407_v9 }
  0xbf   : > { %v415_v11 = vsel %vm414_vm4, %v412_v10, -inf }
  0xc0   : > { %416 = vmax.xlane.f32.xlu0 %v415_v11 }
 0x133   : > { %v417_v13 = vpop.xlane.xlu0 %416 }
 0x134   : > { %v418_v14 = vmax.f32 %v413_v12, %v417_v13 }
 0x136   : > { %v419_v15 = vsub.f32 %v413_v12, %v418_v14  ;;  %438 = vst.msk [vmem:[#allocation2] sm:$0xff] %vm371_vm1, %v418_v14  ;;  %424 = vperm.xlu0 %759, %v418_v14  }
 0x138   : > { %v420_v22 = vmul.f32 1.442695, %v419_v15 }
 0x1a8   : > { %v425_v17 = vpop.permute.xlu0 %424 }
 0x1a9   : > { %v427_v18 = vsub.f32 %v412_v10, %v425_v17 }
 0x1ab   : > { %v428_v19 = vmul.f32 1.442695, %v427_v18 }
 0x1ad   : > { %762 = vpow2.f32 %v428_v19 }
 0x1ae   : > { %764 = vpow2.f32 %v420_v22 }
 0x1b3   : > { %v763_v20 = vpop.eup %762 }
 0x1b4   : > { %674 = vmatmul.msk.f32.vlgmr.msra.gmra.mxu1 %vm414_vm4, %v763_v20  ;;  %v432_v21 = vsel %vm414_vm4, %v763_v20, 0.0  ;;  %v765_v23 = vpop.eup %764 }
 0x1b5   : > { %433 = vadd.xlane.f32.xlu1 %v432_v21  ;;  %v431_v25 = vmul.f32 %v765_v23, %v430_v24 }
 0x1ce   : > { %442 = vperm.xlu1 %760, %v765_v23  }
 0x228   : > { %v434_v26 = vpop.xlane.xlu1 %433 }
 0x229   : > { %v435_v27 = vadd.f32 %v434_v26, %v431_v25 }
 0x22b   : > { %437 = vst.msk [vmem:[#allocation3] sm:$0xff] %vm371_vm1, %v435_v27 }
 0x231   : > { %v466_v33 = vpop.f32.mrf.mxu1 }
 0x232   : > { %v474_v28 = vld [vmem:[#allocation3] sm:$0xff] }
 0x233   : > { %766 = vrcp.f32 %v474_v28 }
 0x239   : > { %v767_v29 = vpop.eup %766 }
 0x23a   : > { %479 = vperm.xlu2 %761, %v767_v29  }
 0x240   : > { %v443_v31 = vpop.permute.xlu1 %442 }
 0x241   : > { %v445_v32 = vmul.f32 %v443_v31, %v439_v30 }
 0x243   : > { %v469_v34 = vadd.f32 %v466_v33, %v445_v32 }
 0x245   : > { %470 = vst.msk [vmem:[#allocation4] sm:$0xff] %vm374_vm0, %v469_v34 }
 0x24c   : > { %v476_v35 = vld [vmem:[#allocation4] sm:$0xff] }
 0x294   : > { %v480_v36 = vpop.permute.xlu2 %479 }
 0x295   : > { %v482_v37 = vmul.f32 %v480_v36, %v476_v35 }
 0x297   : > { %483 = vst.msk [vmem:[%s364_s10] sm:$0xff] %vm374_vm0, %v482_v37 }
 0x298   : > { %915 = shalt.err (!%p912_p10)
}
 0x299   : > { %687 = dma.vmem_to_hbm [thread:$0]  (%p1063_p9), %s499_s11, 128, %s501_s14, %s485_s1  }
 0x29a PF: > { %p707_p12 = scmp.ge.s32.totalorder %s978_s20, 2  ;;  %s512_s30 = sand.u32 1, %s958_s15  }
 0x29b   : > { %s513_s5 = scalar_lea.sflag [#allocation7], %s512_s30 }
 0x29c   : > { %p703_p13 = pnand %p707_p12, %p1070_p11 }
 0x29e   : > { %p704_p0 = pneg %p703_p13 }
 0x2a0   : > { %953 = dma.done.wait (%p704_p0), %s513_s5, 128  }
 0x2a1   : > { %955 = vsyncadd (%p704_p0), %s513_s5, 4294967168  ;;  %s26_s20 = sadd.s32 1, %s978_s20   ;;  %s1219_s6 = sld [smem:[#allocation18_spill]] }
 0x2a2   : > { %p23_p1 = scmp.ge.s32.totalorder %s26_s20, 6   ;;  %s1220_s17 = sld [smem:[#allocation20_spill]] }
 0x2a3   : > { %s1221_s28 = sld [smem:[#allocation19_spill]]  ;;  %s1222_s15 = smov %s962_s16 }
 0x2a4   : > { %s1224_s18 = smov %s974_s19 }
 0x2a5   :  { %25 = sbr.rel (!%p23_p1) target bundleno = 13 (0xd), region = 126 }
 0x2a7   : > { %s1223_s16 = smov %s1219_s6 }
 0x2a9   : > { %s1225_s19 = smov %s1221_s28 }
 0x2aa   :  { %519 = vsyncpa [#allocation6], 1 }
 0x2ab   :  { %521 = vsyncpa [#allocation6 + $0x1], 1 }
 0x2ac   :  { %522 = vsyncpa [#allocation9], 1 }
 0x2ad   :  { %524 = vsyncpa [#allocation9 + $0x1], 1 }
 0x2ae   :  { %525 = vsyncpa [#allocation12], 1 }
 0x2af   :  { %527 = vsyncpa [#allocation12 + $0x1], 1 }
 0x2b0   :  { %528 = vsyncpa [#allocation7], 1 }
 0x2b1   :  { %530 = vsyncpa [#allocation7 + $0x1], 1 }

</bundles_post_ra>
